<compile_context>
chip_gen: v7x
topology: tpu7x:2x2x1
jax: 0.10.0
libtpu: 0.0.40
codegen_flags: <defaults>
</compile_context>

<pallas_src>
import math

import jax
import jax.numpy as jnp
from jax.experimental import pallas as pl
from jax.experimental.pallas import tpu as pltpu

TILE_B = 128  # samples per grid step (lane axis); multiple of 128


def _mlp_kernel(state_ref, action_ref, w1s_ref, w1a_ref, b1_ref, w2_ref, b2_ref, o_ref):
    # state_ref : (8, TB)  f32    batch on the lane axis
    # action_ref: (1, TB)  int32
    # w1s_ref   : (16, 8)  f32    W1 columns for the 8 state features
    # w1a_ref   : (16, 4)  f32    W1 columns for the 4 one-hot action features
    # b1_ref    : (16, 1)  f32
    # w2_ref    : (16, 1)  f32
    # b2_ref    : (1, 1)   f32
    # o_ref     : (1, TB)  f32    lane-dense output slab
    tb = o_ref.shape[-1]

    # one_hot(action, 4) built in-kernel (VPU compare) -> (4, TB)
    onehot = (
        jax.lax.broadcasted_iota(jnp.int32, (4, tb), 0) == action_ref[...]
    ).astype(jnp.float32)

    # layer 1: W1 @ concat(state, onehot) + b1, as two MXU dots (no (B,12) concat)
    h = (
        jnp.dot(w1s_ref[...], state_ref[...], preferred_element_type=jnp.float32)
        + jnp.dot(w1a_ref[...], onehot, preferred_element_type=jnp.float32)
        + b1_ref[...]
    )
    h = jnp.maximum(h, 0.0)  # ReLU

    # layer 2: N=1, K=16 -> skip the MXU; broadcast-multiply + sublane reduce
    out = jnp.sum(h * w2_ref[...], axis=0, keepdims=True) + b2_ref[...]
    o_ref[...] = out.astype(o_ref.dtype)


def _whole(shape):
    # whole-array block, same block every grid step -> stays VMEM resident
    return pl.BlockSpec(shape, lambda i: tuple(0 for _ in shape))


@jax.jit
def feature_nn_forward_batch(states, actions, params):
    """states: f32[B, 8]; actions: int[B] in {0..3}; returns f32[B, 1]."""
    B = states.shape[0]
    b_pad = pl.cdiv(B, TILE_B) * TILE_B
    pad = b_pad - B

    # Layout plumbing in the wrapper: batch goes on the lane axis.
    states_t = jnp.pad(states.astype(jnp.float32), ((0, pad), (0, 0))).T      # (8, b_pad)
    actions_p = jnp.pad(actions.astype(jnp.int32), (0, pad)).reshape(1, b_pad)

    # Weights kept in PyTorch layout in `params`; split/reshape here.
    w1 = params["w1"].astype(jnp.float32)                     # (16, 12)
    w1s = w1[:, :8]                                           # (16, 8)
    w1a = w1[:, 8:]                                           # (16, 4)
    b1 = params["b1"].astype(jnp.float32).reshape(16, 1)      # (16, 1)
    w2 = params["w2"].astype(jnp.float32).reshape(1, 16).T    # (16, 1)
    b2 = params["b2"].astype(jnp.float32).reshape(1, 1)       # (1, 1)

    grid = (b_pad // TILE_B,)
    flops = 2 * b_pad * (16 * 8 + 16 * 4 + 16)
    bytes_accessed = 4 * (
        states_t.size + actions_p.size + w1.size + b1.size + w2.size + b2.size + b_pad
    )

    out = pl.pallas_call(
        _mlp_kernel,
        out_shape=jax.ShapeDtypeStruct((1, b_pad), jnp.float32),
        grid=grid,
        in_specs=[
            pl.BlockSpec((8, TILE_B), lambda i: (0, i)),   # state tile
            pl.BlockSpec((1, TILE_B), lambda i: (0, i)),   # action tile
            _whole((16, 8)),                               # W1 (state part)
            _whole((16, 4)),                               # W1 (action part)
            _whole((16, 1)),                               # b1
            _whole((16, 1)),                               # W2
            _whole((1, 1)),                                # b2
        ],
        out_specs=pl.BlockSpec((1, TILE_B), lambda i: (0, i)),
        compiler_params=pltpu.CompilerParams(dimension_semantics=("parallel",)),
        cost_estimate=pl.CostEstimate(
            flops=flops, transcendentals=0, bytes_accessed=bytes_accessed
        ),
    )(states_t, actions_p, w1s, w1a, b1, w2, b2)

    return out[0, :B].reshape(B, 1)


def feature_nn_forward(state, action, params):
    """Single-sample path matching FeatureNeuralNetwork.forward: returns f32[1]."""
    out = feature_nn_forward_batch(
        jnp.asarray(state, jnp.float32).reshape(1, 8),
        jnp.asarray(action, jnp.int32).reshape(1),
        params,
    )
    return out.reshape(1)


def init_params(key):
    """Mimics nn.Linear default init (uniform +/- 1/sqrt(fan_in)); PyTorch layouts."""
    k1, k2, k3, k4 = jax.random.split(key, 4)
    bound1 = 1.0 / math.sqrt(12.0)
    bound2 = 1.0 / math.sqrt(16.0)
    return {
        "w1": jax.random.uniform(k1, (16, 12), jnp.float32, -bound1, bound1),
        "b1": jax.random.uniform(k2, (16,), jnp.float32, -bound1, bound1),
        "w2": jax.random.uniform(k3, (1, 16), jnp.float32, -bound2, bound2),
        "b2": jax.random.uniform(k4, (1,), jnp.float32, -bound2, bound2),
    }


def _reference(states, actions, params):
    feats = jnp.concatenate(
        [states.astype(jnp.float32), jax.nn.one_hot(actions, 4, dtype=jnp.float32)],
        axis=-1,
    )
    h = jnp.maximum(feats @ params["w1"].T + params["b1"], 0.0)
    return h @ params["w2"].T + params["b2"]


if __name__ == "__main__":
    key = jax.random.PRNGKey(0)
    pkey, skey, akey = jax.random.split(key, 3)
    params = init_params(pkey)

    # LunarLander state has 8 dims; action in {0,1,2,3}. Replay-buffer-style batch.
    B = 256
    states = jax.random.normal(skey, (B, 8), dtype=jnp.float32)
    actions = jax.random.randint(akey, (B,), 0, 4)

    out = feature_nn_forward_batch(states, actions, params)
    jax.block_until_ready(out)

    ref = _reference(states, actions, params)
    assert out.shape == (B, 1)
    assert jnp.allclose(out, ref, atol=1e-5, rtol=1e-5), (out[:4], ref[:4])

    # single-sample path (exact torch-forward semantics: state[8] + scalar action -> (1,))
    out1 = feature_nn_forward(states[0], actions[0], params)
    jax.block_until_ready(out1)
    assert jnp.allclose(out1, ref[0], atol=1e-5, rtol=1e-5), (out1, ref[0])

    print("KERNEL_OK")
</pallas_src>

<mosaic_0001>
module attributes {stable_mosaic.version = 11 : i64} {
  func.func @_mlp_kernel(%arg0: i32, %arg1: memref<8x128xf32, #tpu.memory_space<vmem>>, %arg2: memref<1x128xi32, #tpu.memory_space<vmem>>, %arg3: memref<16x8xf32, #tpu.memory_space<vmem>>, %arg4: memref<16x4xf32, #tpu.memory_space<vmem>>, %arg5: memref<16x1xf32, #tpu.memory_space<vmem>>, %arg6: memref<16x1xf32, #tpu.memory_space<vmem>>, %arg7: memref<1x1xf32, #tpu.memory_space<vmem>>, %arg8: memref<1x128xf32, #tpu.memory_space<vmem>>) attributes {dimension_semantics = [#tpu.dimension_semantics<parallel>], iteration_bounds = array<i64: 2>, scalar_prefetch = 0 : i64, scratch_operands = 0 : i64, tpu.core_type = #tpu.core_type<tc>, window_params = [{transform_indices = @transform_0, window_bounds = array<i64: 8, 128>}, {transform_indices = @transform_1, window_bounds = array<i64: 1, 128>}, {pipeline_mode = #tpu.pipeline_mode<synchronous>, transform_indices = @transform_2, window_bounds = array<i64: 16, 8>}, {pipeline_mode = #tpu.pipeline_mode<synchronous>, transform_indices = @transform_3, window_bounds = array<i64: 16, 4>}, {pipeline_mode = #tpu.pipeline_mode<synchronous>, transform_indices = @transform_4, window_bounds = array<i64: 16, 1>}, {pipeline_mode = #tpu.pipeline_mode<synchronous>, transform_indices = @transform_5, window_bounds = array<i64: 16, 1>}, {pipeline_mode = #tpu.pipeline_mode<synchronous>, transform_indices = @transform_6, window_bounds = array<i64: 1, 1>}, {transform_indices = @transform_7, window_bounds = array<i64: 1, 128>}]} {
    %0 = tpu.iota {dimensions = array<i32: 0>} : vector<4x128xi32>
    %c0 = arith.constant 0 : index
    %c0_0 = arith.constant 0 : index
    %1 = vector.load %arg2[%c0, %c0_0] : memref<1x128xi32, #tpu.memory_space<vmem>>, vector<1x128xi32>
    %2 = vector.broadcast %1 : vector<1x128xi32> to vector<4x128xi32>
    %3 = arith.cmpi eq, %0, %2 : vector<4x128xi32>
    %4 = arith.extui %3 : vector<4x128xi1> to vector<4x128xi32>
    %5 = arith.sitofp %4 : vector<4x128xi32> to vector<4x128xf32>
    %c0_1 = arith.constant 0 : index
    %c0_2 = arith.constant 0 : index
    %6 = vector.load %arg3[%c0_1, %c0_2] : memref<16x8xf32, #tpu.memory_space<vmem>>, vector<16x8xf32>
    %c0_3 = arith.constant 0 : index
    %c0_4 = arith.constant 0 : index
    %7 = vector.load %arg1[%c0_3, %c0_4] : memref<8x128xf32, #tpu.memory_space<vmem>>, vector<8x128xf32>
    %cst = arith.constant dense<0.000000e+00> : vector<16x128xf32>
    %8 = tpu.matmul %6, %7, %cst {dimension_numbers = #tpu.dot_dimension_numbers<[1], [0], [0], [1], [0, 0, 1, 1], [], []>} : vector<16x8xf32>, vector<8x128xf32>, vector<16x128xf32> -> vector<16x128xf32>
    %c0_5 = arith.constant 0 : index
    %c0_6 = arith.constant 0 : index
    %9 = vector.load %arg4[%c0_5, %c0_6] : memref<16x4xf32, #tpu.memory_space<vmem>>, vector<16x4xf32>
    %cst_7 = arith.constant dense<0.000000e+00> : vector<16x128xf32>
    %10 = tpu.matmul %9, %5, %cst_7 {dimension_numbers = #tpu.dot_dimension_numbers<[1], [0], [0], [1], [0, 0, 1, 1], [], []>} : vector<16x4xf32>, vector<4x128xf32>, vector<16x128xf32> -> vector<16x128xf32>
    %11 = arith.addf %8, %10 : vector<16x128xf32>
    %c0_8 = arith.constant 0 : index
    %c0_9 = arith.constant 0 : index
    %12 = vector.load %arg5[%c0_8, %c0_9] : memref<16x1xf32, #tpu.memory_space<vmem>>, vector<16x1xf32>
    %13 = vector.broadcast %12 : vector<16x1xf32> to vector<16x128xf32>
    %14 = arith.addf %11, %13 : vector<16x128xf32>
    %cst_10 = arith.constant 0.000000e+00 : f32
    %15 = vector.broadcast %cst_10 : f32 to vector<16x128xf32>
    %16 = arith.maximumf %14, %15 : vector<16x128xf32>
    %c0_11 = arith.constant 0 : index
    %c0_12 = arith.constant 0 : index
    %17 = vector.load %arg6[%c0_11, %c0_12] : memref<16x1xf32, #tpu.memory_space<vmem>>, vector<16x1xf32>
    %18 = vector.broadcast %17 : vector<16x1xf32> to vector<16x128xf32>
    %19 = arith.mulf %16, %18 : vector<16x128xf32>
    %cst_13 = arith.constant dense<0.000000e+00> : vector<128xf32>
    %20 = vector.multi_reduction <add>, %19, %cst_13 [0] : vector<16x128xf32> to vector<128xf32>
    %21 = vector.shape_cast %20 : vector<128xf32> to vector<1x128xf32>
    %c0_14 = arith.constant 0 : index
    %c0_15 = arith.constant 0 : index
    %22 = vector.load %arg7[%c0_14, %c0_15] : memref<1x1xf32, #tpu.memory_space<vmem>>, vector<1x1xf32>
    %23 = vector.broadcast %22 : vector<1x1xf32> to vector<1x128xf32>
    %24 = arith.addf %21, %23 : vector<1x128xf32>
    %c0_16 = arith.constant 0 : index
    %c0_17 = arith.constant 0 : index
    %25 = vector.load %arg8[%c0_16, %c0_17] : memref<1x128xf32, #tpu.memory_space<vmem>>, vector<1x128xf32>
    tpu.vector_store %arg8[%c0_16, %c0_17], %24 {strides = array<i32>} : memref<1x128xf32, #tpu.memory_space<vmem>>, vector<1x128xf32>,
    return
  }
  func.func @transform_0(%arg0: i32) -> (i32, i32) {
    %c0_i32 = arith.constant 0 : i32
    %c0_i32_0 = arith.constant 0 : i32
    return %c0_i32, %arg0 : i32, i32
  }
  func.func @transform_1(%arg0: i32) -> (i32, i32) {
    %c0_i32 = arith.constant 0 : i32
    %c0_i32_0 = arith.constant 0 : i32
    return %c0_i32, %arg0 : i32, i32
  }
  func.func @transform_2(%arg0: i32) -> (i32, i32) {
    %c0_i32 = arith.constant 0 : i32
    %c0_i32_0 = arith.constant 0 : i32
    %c0_i32_1 = arith.constant 0 : i32
    return %c0_i32, %c0_i32_0 : i32, i32
  }
  func.func @transform_3(%arg0: i32) -> (i32, i32) {
    %c0_i32 = arith.constant 0 : i32
    %c0_i32_0 = arith.constant 0 : i32
    %c0_i32_1 = arith.constant 0 : i32
    return %c0_i32, %c0_i32_0 : i32, i32
  }
  func.func @transform_4(%arg0: i32) -> (i32, i32) {
    %c0_i32 = arith.constant 0 : i32
    %c0_i32_0 = arith.constant 0 : i32
    %c0_i32_1 = arith.constant 0 : i32
    return %c0_i32, %c0_i32_0 : i32, i32
  }
  func.func @transform_5(%arg0: i32) -> (i32, i32) {
    %c0_i32 = arith.constant 0 : i32
    %c0_i32_0 = arith.constant 0 : i32
    %c0_i32_1 = arith.constant 0 : i32
    return %c0_i32, %c0_i32_0 : i32, i32
  }
  func.func @transform_6(%arg0: i32) -> (i32, i32) {
    %c0_i32 = arith.constant 0 : i32
    %c0_i32_0 = arith.constant 0 : i32
    %c0_i32_1 = arith.constant 0 : i32
    return %c0_i32, %c0_i32_0 : i32, i32
  }
  func.func @transform_7(%arg0: i32) -> (i32, i32) {
    %c0_i32 = arith.constant 0 : i32
    %c0_i32_0 = arith.constant 0 : i32
    return %c0_i32, %arg0 : i32, i32
  }
}

</mosaic_0001>

<bundles_post_ra>
// kernel: feature_nn_forward_batch.1
= control target key start
LH: loop header
LB: loop body
LE: loop exit
PB: predicated region body
PF: predicated region fallthrough
CT: control target
= control target key end

     0   :  { %s915_s0 = inlined_call_operand.vmem [shape: f32[8,256], index: 0, kind: input, shape index: {}]   ;;  %s916_s1 = inlined_call_operand.vmem [shape: s32[1,256], index: 1, kind: input, shape index: {}]   ;;  %s917_s2 = inlined_call_operand.vmem [shape: f32[16,8], index: 2, kind: input, shape index: {}]   ;;  %s918_s3 = inlined_call_operand.vmem [shape: f32[16,4], index: 3, kind: input, shape index: {}]   ;;  %s919_s4 = inlined_call_operand.vmem [shape: f32[16,1], index: 4, kind: input, shape index: {}]   ;;  %s920_s5 = inlined_call_operand.vmem [shape: f32[16,1], index: 5, kind: input, shape index: {}]   ;;  %s921_s6 = inlined_call_operand.<no memory space> [shape: f32[1,1], index: 6, kind: input, shape index: {}]   ;;  %s922_s7 = inlined_call_operand.hbm [shape: f32[1,256], index: 7, kind: output, shape index: {}]  }
   0x1   :  { %v12_v0 = vstv %s921_s6 }
   0x2   :  { %13 = vst [vmem:[#allocation2] sm:$0x1] %v12_v0 }
   0x3   :  { %14 = vsyncpa [#allocation4], 0 }
   0x4   :  { %16 = vsyncpa [#allocation4 + $0x1], 0  ;;  %s784_s26 = smov 0   ;;  %s786_s27 = smov 0  }
   0x5   :  { %s788_s28 = smov 0   ;;  %s790_s29 = smov 0  }
   0x6 LB: > { %s805_s6 = sadd.s32 4294967295, %s736_s29   ;;  %s598_s30 = sadd.s32 4294967294, %s736_s29   ;;  %s736_s29 = sphi %s790_s29, %s928_s29   ;;  %s732_s28 = sphi %s788_s28, %s927_s28   ;;  %s728_s27 = sphi %s786_s27, %s926_s27   ;;  %s724_s26 = sphi %s784_s26, %s925_s26  }
   0x7   : > { %s809_s8 = sadd.s32 1, %s736_s29   ;;  %s186_s9 = sadd.s32 1, %s732_s28 }
   0x8   : > { %s183_s10 = ssub.s32 %s736_s29, %s809_s8  ;;  %p196_p0 = scmp.ne.s32.totalorder %s732_s28, %s728_s27 }
   0x9   : > { %p184_p1 = scmp.eq.s32.totalorder %s183_s10, 0  ;;  %p197_p2 = scmp.eq.s32.totalorder %s805_s6, 1 }
   0xa   : > { %p202_p3 = scmp.ne.s32.totalorder %s728_s27, %s724_s26  ;;  %p203_p4 = scmp.eq.s32.totalorder %s598_s30, 1 }
   0xb   : > { %s820_s11 = scalar_select %p184_p1, %s732_s28, %s186_s9  }
   0xc   : > { %p822_p5 = por %p197_p2, %p196_p0  ;;  %p826_p6 = por %p203_p4, %p202_p3 }
   0xd   : > { %p601_p7 = scmp.ge.s32.totalorder %s736_s29, 1  ;;  %p249_p8 = scmp.lt.s32.totalorder %s736_s29, 3 }
   0xf   : > { %p250_p9 = pnand %p601_p7, %p249_p8 }
  0x10   : > { %p282_p10 = scmp.lt.s32.totalorder (!%p250_p9), %s805_s6, 1  ;;  %v289_v1 = vlaneseq (!%p250_p9)  ;;  %v299_v2 = vld [vmem:[%s917_s2] sm:$0xff] (!%p250_p9)  ;;  %vm390_vm0 = vcmask (!%p250_p9), 64512   ;;  %vm304_vm1 = vcmask (!%p250_p9), 31744   ;;  %v738_v6 = vmov (!%p250_p9), 0   ;;  %v473_v8 = vld [vmem:[%s919_s4 + $0x8] sm:$0xff] (!%p250_p9) }
  0x11   : > { %253 = sbr.rel (%p250_p9) target bundleno = 283 (0x11b), region = 48  ;;  %v302_v3 = vld [vmem:[%s918_s3] sm:$0xff] (!%p250_p9)  ;;  %626 = vmatprep.mubr.msk.f32.mxu0 (!%p250_p9), %vm390_vm0, %v299_v2  ;;  %672 = vset.pattern.permute.xlu0 (!%p250_p9), %v738_v6  ;;  %vm311_vm2 = vcmask (!%p250_p9), 1043456   ;;  %v300_v11 = vld [vmem:[%s917_s2 + $0x8] sm:$0xff] (!%p250_p9)  ;;  %v739_v12 = vmov (!%p250_p9), 0.0   ;;  %s610_s24 = sshll.u32 (!%p250_p9), %s805_s6, 4 }
  0x12   : > { %v472_v4 = vld [vmem:[%s919_s4] sm:$0xff] (!%p250_p9)  ;;  %v290_v5 = vshrl.u32 (!%p250_p9), %v289_v1, 7  ;;  %621 = vmatprep.mubr.msk.f32.mxu1 (!%p250_p9), %vm304_vm1, %v302_v3  ;;  %673 = vset.pattern.permute.xlu1 (!%p250_p9), %v738_v6  ;;  %v303_v14 = vld [vmem:[%s918_s3 + $0x8] sm:$0xff] (!%p250_p9)  ;;  %s873_s14 = scalar_lea.hbm (!%p250_p9), %s922_s7, %s610_s24 }
  0x13   : > { %v488_v7 = vld [vmem:[%s920_s5] sm:$0xff] (!%p250_p9)  ;;  %476 = vperm.xlu0 (!%p250_p9), %672, %v472_v4   ;;  %v489_v15 = vld [vmem:[%s920_s5 + $0x8] sm:$0xff] (!%p250_p9) }
  0x14   : > { %492 = vperm.xlu1 (!%p250_p9), %673, %v488_v7   ;;  %v509_v16 = vld [vmem:[#allocation2] sm:$0x1] (!%p250_p9)  ;;  %v517_v37 = vsub.s32 (!%p250_p9), 0, %v290_v5 }
  0x17   : > { %481 = vperm.xlu0 (!%p250_p9), %672, %v473_v8  }
  0x18   : > { %s283_s20 = scalar_select %p282_p10, %s805_s6, 1  ;;  %497 = vperm.xlu1 %673, %v489_v15  }
  0x19   : > { %s740_s6 = smov [#allocation3]  }
  0x1a   : > { %s602_s23 = sshll.u32 %s283_s20, 3  ;;  %s288_s30 = scalar_lea.vmem %s916_s1, %s283_s20 }
  0x1b   : > { %s285_s16 = scalar_lea.vmem %s915_s0, %s602_s23  ;;  %v603_v9 = vld [vmem:[%s288_s30] ss:$0 sm:$0xff]  ;;  %512 = vperm.xlu0 %672, %v509_v16   ;;  %s280_s23 = sand.u32 1, %s728_s27  }
  0x1c   : > { %v301_v10 = vld [vmem:[%s285_s16] sm:$0xff]  ;;  %vm296_vm3 = vcmp.eq.s32.totalorder %v290_v5, %v603_v9  ;;  %s281_s25 = scalar_lea.vmem [#allocation3], %s280_s23  ;;  %s522_s15 = scalar_lea.sflag [#allocation4], %s280_s23 }
  0x1d   : > { %624 = vmatprep.subr.mxu0 %v301_v10  ;;  %v604_v13 = vsel %vm296_vm3, 1.0, %v739_v12  ;;  %s534_s30 = sshll.u32 %s281_s25, 4  ;;  %s678_s17 = sshll.u32 %s740_s6, 4  ;;  %s875_s30 = int_to_ptr.vmem [resolvable:$true] %s534_s30  ;;  %s679_s17 = int_to_ptr.vmem [resolvable:$false] %s678_s17 }
  0x1e   : > { %619 = vmatprep.subr.msk.mxu1 %vm311_vm2, %v604_v13  ;;  %625 = vmatpush3.msra.mxu0 %v301_v10  ;;  %s674_s16 = scalar_lea.vmem %s875_s30, 16  ;;  %s680_s18 = scalar_lea.vmem %s679_s17, 32 }
  0x1f   : > { %620 = vmatpush3.msk.msra.mxu1 %vm311_vm2, %v604_v13  ;;  %627 = vmatmul.mubr.msk.f32.vlgmr.msra.gmra.mrb[0].mxu0 %vm390_vm0, %v300_v11  ;;  %p675_p11 = scmp.ne.s32.totalorder %s875_s30, %s674_s16  ;;  %p681_p0 = scmp.lt.s32.totalorder %s875_s30, %s679_s17 }
  0x20   : > { %622 = vmatmul.mubr.msk.f32.vlgmr.msra.gmra.mrb[0].mxu1 %vm304_vm1, %v303_v14  ;;  %p682_p1 = scmp.lt.s32.totalorder %s680_s18, %s674_s16 }
  0x21   : > { %p676_p12 = pnand %p675_p11, %p822_p5 }
  0x22   : > { %p683_p2 = por %p682_p1, %p681_p0 }
  0x23   : > { %p677_p13 = pneg %p676_p12 }
  0x25   : > { %p684_p3 = pnand %p683_p2, %p677_p13 }
  0x92   : > { %v477_v17 = vpop.permute.xlu0 %476 }
  0x93   : > { %v493_v18 = vpop.permute.xlu1 %492 }
  0x96   : > { %v482_v24 = vpop.permute.xlu0 %481 }
  0x97   : > { %v498_v30 = vpop.permute.xlu1 %497 }
  0x9a   : > { %v513_v39 = vpop.permute.xlu0 %512 }
  0x9b   : > { %v518_v41 = vrot.slane %v513_v39, %v517_v37 }
  0xf2   : > { %v628_v19 = vpop.f32.mrb[0].mxu0 }
  0xf3   : > { %v623_v20 = vpop.f32.mrb[0].mxu1  ;;  %v463_v21 = vpop.f32.mrb[1].mxu0 }
  0xf4   : > { %v469_v22 = vadd.f32 %v628_v19, %v623_v20  ;;  %v381_v23 = vpop.f32.mrb[1].mxu1 }
  0xf5   : > { %v464_v25 = vadd.f32 %v463_v21, %v381_v23 }
  0xf6   : > { %v485_v26 = vadd.f32 %v482_v24, %v469_v22 }
  0xf7   : > { %v484_v27 = vadd.f32 %v477_v17, %v464_v25 }
  0xf8   : > { %v487_v28 = vmax.f32 %v485_v26, 0.0 }
  0xf9   : > { %v486_v29 = vmax.f32 %v484_v27, 0.0 }
  0xfa   : > { %v501_v31 = vmul.f32 %v498_v30, %v487_v28 }
  0xfb   : > { %v500_v32 = vmul.f32 %v493_v18, %v486_v29 }
  0xfd   : > { %v502_v33 = vadd.f32 %v501_v31, %v500_v32 }
  0xff   : > { %v503_v34 = vrot.slane %v502_v33, 4 }
 0x101   : > { %v504_v35 = vadd.f32 %v503_v34, %v502_v33 }
 0x103   : > { %v505_v36 = vrot.slane %v504_v35, 2 }
 0x105   : > { %v506_v38 = vadd.f32 %v505_v36, %v504_v35 }
 0x107   : > { %v507_v40 = vrot.slane %v506_v38, 1 }
 0x109   : > { %v508_v42 = vadd.f32 %v507_v40, %v506_v38 }
 0x10b   : > { %v519_v43 = vadd.f32 %v518_v41, %v508_v42 }
 0x10d   : > { %520 = vst [vmem:[%s281_s25] sm:$0x1] %v519_v43 }
 0x10e   : > { %687 = shalt.err (!%p684_p3)
}
 0x10f   : > { %s688_s19 = scalar_lea.hbm %s873_s14, 16  ;;  %s692_s22 = scalar_lea.hbm %s922_s7, 32 }
 0x110   : > { %p689_p4 = scmp.ne.s32.totalorder %s873_s14, %s688_s19  ;;  %p693_p9 = scmp.lt.u32.totalorder %s873_s14, %s922_s7 }
 0x111   : > { %p694_p10 = scmp.lt.u32.totalorder %s692_s22, %s688_s19  ;;  %p696_p12 = scmp.lt.u32.totalorder %s688_s19, %s873_s14 }
 0x112   : > { %p690_p7 = pnand %p689_p4, %p822_p5 }
 0x113   : > { %p695_p11 = por %p694_p10, %p693_p9 }
 0x114   : > { %p691_p8 = pneg %p690_p7 }
 0x115   : > { %p697_p13 = por %p696_p12, %p695_p11 }
 0x117   : > { %p698_p0 = pnand %p697_p13, %p691_p8 }
 0x119   : > { %701 = shalt.err (!%p698_p0)
}
 0x11a   : > { %631 = dma.vmem_to_hbm [thread:$0]  (%p822_p5), %s875_s30, 16, %s873_s14, %s522_s15  }
 0x11b PF: > { %p637_p1 = scmp.ge.s32.totalorder %s736_s29, 2  ;;  %s546_s25 = sand.u32 1, %s724_s26  }
 0x11c   : > { %s547_s9 = scalar_lea.sflag [#allocation4], %s546_s25 }
 0x11d   : > { %p634_p2 = pnand %p637_p1, %p826_p6 }
 0x11f   : > { %719 = dma.done.wait (!%p634_p2), %s547_s9, 16  }
 0x120   : > { %721 = vsyncadd (!%p634_p2), %s547_s9, 4294967280  ;;  %p19_p3 = scmp.ge.s32.totalorder %s809_s8, 4   ;;  %s925_s26 = smov %s728_s27 }
 0x121   : > { %s926_s27 = smov %s732_s28  ;;  %s927_s28 = smov %s820_s11 }
 0x122   : > { %s928_s29 = smov %s809_s8  ;;  %21 = sbr.rel (!%p19_p3) target bundleno = 6 (0x6), region = 86 }
 0x129   :  { %551 = vsyncpa [#allocation4], 1 }
 0x12a   :  { %553 = vsyncpa [#allocation4 + $0x1], 1 }

</bundles_post_ra>
